<compile_context>
chip_gen: v6e
topology: v6e:2x2x1
jax: 0.10.0
libtpu: 0.0.40
codegen_flags: <defaults>
</compile_context>

<pallas_src>
import numpy as np
import jax
import jax.numpy as jnp
from jax.experimental import pallas as pl
from jax.experimental.pallas import tpu as pltpu

HIDDEN_DIM = 400


def _round_up(n, m):
    return ((n + m - 1) // m) * m


def _padded_bytes(shape, dtype):
    """VMEM footprint of one buffer after hardware lane/sublane padding."""
    itemsize = np.dtype(dtype).itemsize
    sublane = 8 * (4 // itemsize)          # 8 rows for f32, 16 for bf16
    s = list(shape)
    s[-1] = _round_up(s[-1], 128)
    if len(s) >= 2:
        s[-2] = _round_up(s[-2], sublane)
    return int(np.prod(s)) * itemsize


def _encoder_kernel(x_ref, w1_ref, b1_ref, wh_ref, bh_ref, out_ref, h_acc):
    # Grid axis 0 tiles the flattened-image reduction dimension D ("arbitrary").
    # x_ref: (B, tk) bf16   w1_ref: (tk, H) bf16   b1_ref: (1, H) f32
    # wh_ref: (H, Z2p) f32  bh_ref: (1, Z2p) f32   out_ref: (B, Z2p) f32
    # h_acc:  (B, H) f32 VMEM scratch accumulator
    k = pl.program_id(0)

    @pl.when(k == 0)
    def _():
        h_acc[...] = jnp.zeros_like(h_acc)

    # Partial hidden-layer matmul on the MXU (bf16 x bf16 -> f32 accumulate).
    h_acc[...] += jnp.dot(x_ref[...], w1_ref[...],
                          preferred_element_type=jnp.float32)

    # Bias + ReLU + fused (mu || log_var) head only after the full reduction.
    @pl.when(k == pl.num_programs(0) - 1)
    def _():
        h = jnp.maximum(h_acc[...] + b1_ref[...], 0.0)
        out_ref[...] = (jnp.dot(h, wh_ref[...],
                                preferred_element_type=jnp.float32)
                        + bh_ref[...]).astype(out_ref.dtype)


def prepare_params(params, image_shape, *, block_k=8192):
    """One-time parameter prep (call once, reuse across forwards).

    - Fuses the two heads into one (H, 2Z) weight / (1, 2Z) bias, zero-padded
      to 128 output lanes for unmasked stores.
    - Pads W1 rows to the k-tile grid ONCE and casts it to bfloat16 for the
      streamed matmul (f32 accumulation happens in the kernel).
    """
    D = int(np.prod(image_shape))
    D128 = _round_up(D, 128)
    tk = min(_round_up(block_k, 128), D128)
    nk = -(-D128 // tk)
    D_pad = nk * tk

    w1 = params["w1"]
    if D_pad != D:
        w1 = jnp.pad(w1, ((0, D_pad - D), (0, 0)))
    w1 = w1.astype(jnp.bfloat16)

    wh = jnp.concatenate([params["wmu"], params["wlv"]], axis=1)
    bh = jnp.concatenate([params["bmu"], params["blv"]], axis=1)
    Z = params["wmu"].shape[1]
    Z2 = 2 * Z
    Z2p = _round_up(Z2, 128)
    if Z2p != Z2:
        wh = jnp.pad(wh, ((0, 0), (0, Z2p - Z2)))
        bh = jnp.pad(bh, ((0, 0), (0, Z2p - Z2)))

    return {
        "w1": w1, "b1": params["b1"], "wh": wh, "bh": bh,
        "D": D, "D_pad": D_pad, "tk": tk, "nk": nk, "z_dim": Z,
    }


def encoder_forward(x, prep):
    """x: (B, C, H, W) float32.  prep: output of prepare_params.
    Returns (mu, log_var), each (B, z_dim) float32."""
    B = x.shape[0]
    D, D_pad, tk, nk = prep["D"], prep["D_pad"], prep["tk"], prep["nk"]
    Z = prep["z_dim"]
    w1, b1, wh, bh = prep["w1"], prep["b1"], prep["wh"], prep["bh"]
    H = w1.shape[1]
    Z2p = wh.shape[1]

    x_flat = x.reshape(B, -1)                       # same as torch x.view(B, -1)
    assert x_flat.shape[1] == D
    if D_pad != D:
        x_flat = jnp.pad(x_flat, ((0, 0), (0, D_pad - D)))   # tiny (B rows only)
    x_bf = x_flat.astype(jnp.bfloat16)

    # VMEM budget from hardware-padded tile shapes (double buffers for every
    # pipelined block + the resident accumulator), with headroom.
    vmem_bytes = (2 * (_padded_bytes((B, tk), jnp.bfloat16)
                       + _padded_bytes((tk, H), jnp.bfloat16)
                       + _padded_bytes((1, H), jnp.float32)
                       + _padded_bytes((H, Z2p), jnp.float32)
                       + _padded_bytes((1, Z2p), jnp.float32)
                       + _padded_bytes((B, Z2p), jnp.float32))
                  + _padded_bytes((B, H), jnp.float32))
    vmem_limit = int(min(64 << 20, max(4 << 20, int(1.5 * vmem_bytes) + (2 << 20))))

    out = pl.pallas_call(
        _encoder_kernel,
        out_shape=jax.ShapeDtypeStruct((B, Z2p), jnp.float32),
        grid=(nk,),
        in_specs=[
            pl.BlockSpec((B, tk), lambda k: (0, k)),    # x   (streamed, bf16)
            pl.BlockSpec((tk, H), lambda k: (k, 0)),    # W1  (streamed, bf16)
            pl.BlockSpec((1, H), lambda k: (0, 0)),     # b1  (resident, f32)
            pl.BlockSpec((H, Z2p), lambda k: (0, 0)),   # fused head W (f32)
            pl.BlockSpec((1, Z2p), lambda k: (0, 0)),   # fused head b (f32)
        ],
        out_specs=pl.BlockSpec((B, Z2p), lambda k: (0, 0)),
        scratch_shapes=[pltpu.VMEM((B, H), jnp.float32)],
        compiler_params=pltpu.CompilerParams(
            dimension_semantics=("arbitrary",),
            vmem_limit_bytes=vmem_limit),
    )(x_bf, w1, b1, wh, bh)

    mu = out[:, :Z]
    log_var = out[:, Z:2 * Z]
    return mu, log_var


def init_params(key, image_shape, z_dim):
    """Deterministic init mirroring nn.Linear default (uniform +-1/sqrt(fan_in)).
    Weights stored pre-transposed as (in, out)."""
    D = int(np.prod(image_shape))
    H = HIDDEN_DIM
    ks = jax.random.split(key, 6)

    def lin(kw, kb, fan_in, fan_out):
        bound = 1.0 / np.sqrt(fan_in)
        w = jax.random.uniform(kw, (fan_in, fan_out), jnp.float32, -bound, bound)
        b = jax.random.uniform(kb, (1, fan_out), jnp.float32, -bound, bound)
        return w, b

    w1, b1 = lin(ks[0], ks[1], D, H)
    wmu, bmu = lin(ks[2], ks[3], H, z_dim)
    wlv, blv = lin(ks[4], ks[5], H, z_dim)
    return {"w1": w1, "b1": b1, "wmu": wmu, "bmu": bmu, "wlv": wlv, "blv": blv}


if __name__ == "__main__":
    key = jax.random.PRNGKey(0)
    k_x, k_p = jax.random.split(key)

    image_shape = (4, 16, 16)   # (C, H, W) -> D = 1024
    z_dim = 32
    batch = 2

    x = jax.random.normal(k_x, (batch,) + image_shape, dtype=jnp.float32)
    params = init_params(k_p, image_shape, z_dim)

    # block_k=256 so the toy shape exercises the multi-step K reduction
    # (grid = 4); real image sizes would use the default block_k=8192.
    prep = prepare_params(params, image_shape, block_k=256)
    mu, log_var = encoder_forward(x, prep)
    jax.block_until_ready((mu, log_var))

    # Reference check (numpy f32, with the first-layer operands rounded to
    # bf16 exactly like the kernel streams them; heads stay f32).
    x_flat = np.asarray(x).reshape(batch, -1)
    xb = np.asarray(jnp.asarray(x_flat).astype(jnp.bfloat16).astype(jnp.float32))
    w1b = np.asarray(jnp.asarray(params["w1"]).astype(jnp.bfloat16).astype(jnp.float32))
    h_ref = np.maximum(xb @ w1b + np.asarray(params["b1"]), 0.0)
    mu_ref = h_ref @ np.asarray(params["wmu"]) + np.asarray(params["bmu"])
    lv_ref = h_ref @ np.asarray(params["wlv"]) + np.asarray(params["blv"])

    assert mu.shape == (batch, z_dim) and log_var.shape == (batch, z_dim)
    np.testing.assert_allclose(np.asarray(mu), mu_ref, rtol=5e-3, atol=5e-3)
    np.testing.assert_allclose(np.asarray(log_var), lv_ref, rtol=5e-3, atol=5e-3)

    print("KERNEL_OK")
</pallas_src>

<mosaic_0001>
module attributes {stable_mosaic.version = 11 : i64} {
  func.func @_encoder_kernel(%arg0: i32, %arg1: memref<2x256xbf16, #tpu.memory_space<vmem>>, %arg2: memref<256x400xbf16, #tpu.memory_space<vmem>>, %arg3: memref<1x400xf32, #tpu.memory_space<vmem>>, %arg4: memref<400x128xf32, #tpu.memory_space<vmem>>, %arg5: memref<1x128xf32, #tpu.memory_space<vmem>>, %arg6: memref<2x128xf32, #tpu.memory_space<vmem>>, %arg7: memref<2x400xf32, #tpu.memory_space<vmem>>) attributes {dimension_semantics = [#tpu.dimension_semantics<arbitrary>], iteration_bounds = array<i64: 4>, scalar_prefetch = 0 : i64, scratch_operands = 1 : i64, tpu.core_type = #tpu.core_type<tc>, window_params = [{transform_indices = @transform_0, window_bounds = array<i64: 2, 256>}, {transform_indices = @transform_1, window_bounds = array<i64: 256, 400>}, {pipeline_mode = #tpu.pipeline_mode<synchronous>, transform_indices = @transform_2, window_bounds = array<i64: 1, 400>}, {pipeline_mode = #tpu.pipeline_mode<synchronous>, transform_indices = @transform_3, window_bounds = array<i64: 400, 128>}, {pipeline_mode = #tpu.pipeline_mode<synchronous>, transform_indices = @transform_4, window_bounds = array<i64: 1, 128>}, {pipeline_mode = #tpu.pipeline_mode<synchronous>, transform_indices = @transform_5, window_bounds = array<i64: 2, 128>}]} {
    %c0_i32 = arith.constant 0 : i32
    %0 = arith.cmpi eq, %arg0, %c0_i32 : i32
    %1 = arith.extui %0 : i1 to i32
    %c0_i32_0 = arith.constant 0 : i32
    %2 = arith.cmpi ne, %1, %c0_i32_0 : i32
    scf.if %2 {
      %cst_9 = arith.constant 0.000000e+00 : f32
      %12 = vector.broadcast %cst_9 : f32 to vector<2x400xf32>
      %c0_10 = arith.constant 0 : index
      %c0_11 = arith.constant 0 : index
      %13 = vector.load %arg7[%c0_10, %c0_11] : memref<2x400xf32, #tpu.memory_space<vmem>>, vector<2x400xf32>
      tpu.vector_store %arg7[%c0_10, %c0_11], %12 {strides = array<i32>} : memref<2x400xf32, #tpu.memory_space<vmem>>, vector<2x400xf32>,
    } else {
    }
    %c0 = arith.constant 0 : index
    %c0_1 = arith.constant 0 : index
    %3 = vector.load %arg7[%c0, %c0_1] : memref<2x400xf32, #tpu.memory_space<vmem>>, vector<2x400xf32>
    %c0_2 = arith.constant 0 : index
    %c0_3 = arith.constant 0 : index
    %4 = vector.load %arg1[%c0_2, %c0_3] : memref<2x256xbf16, #tpu.memory_space<vmem>>, vector<2x256xbf16>
    %c0_4 = arith.constant 0 : index
    %c0_5 = arith.constant 0 : index
    %5 = vector.load %arg2[%c0_4, %c0_5] : memref<256x400xbf16, #tpu.memory_space<vmem>>, vector<256x400xbf16>
    %cst = arith.constant dense<0.000000e+00> : vector<2x400xf32>
    %6 = tpu.matmul %4, %5, %cst {dimension_numbers = #tpu.dot_dimension_numbers<[1], [0], [0], [1], [0, 0, 1, 1], [], []>} : vector<2x256xbf16>, vector<256x400xbf16>, vector<2x400xf32> -> vector<2x400xf32>
    %7 = arith.addf %3, %6 : vector<2x400xf32>
    %c0_6 = arith.constant 0 : index
    %c0_7 = arith.constant 0 : index
    %8 = vector.load %arg7[%c0_6, %c0_7] : memref<2x400xf32, #tpu.memory_space<vmem>>, vector<2x400xf32>
    tpu.vector_store %arg7[%c0_6, %c0_7], %7 {strides = array<i32>} : memref<2x400xf32, #tpu.memory_space<vmem>>, vector<2x400xf32>,
    %c3_i32 = arith.constant 3 : i32
    %9 = arith.cmpi eq, %arg0, %c3_i32 : i32
    %10 = arith.extui %9 : i1 to i32
    %c0_i32_8 = arith.constant 0 : i32
    %11 = arith.cmpi ne, %10, %c0_i32_8 : i32
    scf.if %11 {
      %c0_9 = arith.constant 0 : index
      %c0_10 = arith.constant 0 : index
      %12 = vector.load %arg7[%c0_9, %c0_10] : memref<2x400xf32, #tpu.memory_space<vmem>>, vector<2x400xf32>
      %c0_11 = arith.constant 0 : index
      %c0_12 = arith.constant 0 : index
      %13 = vector.load %arg3[%c0_11, %c0_12] : memref<1x400xf32, #tpu.memory_space<vmem>>, vector<1x400xf32>
      %14 = vector.broadcast %13 : vector<1x400xf32> to vector<2x400xf32>
      %15 = arith.addf %12, %14 : vector<2x400xf32>
      %cst_13 = arith.constant 0.000000e+00 : f32
      %16 = vector.broadcast %cst_13 : f32 to vector<2x400xf32>
      %17 = arith.maximumf %15, %16 : vector<2x400xf32>
      %c0_14 = arith.constant 0 : index
      %c0_15 = arith.constant 0 : index
      %18 = vector.load %arg4[%c0_14, %c0_15] : memref<400x128xf32, #tpu.memory_space<vmem>>, vector<400x128xf32>
      %cst_16 = arith.constant dense<0.000000e+00> : vector<2x128xf32>
      %19 = tpu.matmul %17, %18, %cst_16 {dimension_numbers = #tpu.dot_dimension_numbers<[1], [0], [0], [1], [0, 0, 1, 1], [], []>} : vector<2x400xf32>, vector<400x128xf32>, vector<2x128xf32> -> vector<2x128xf32>
      %c0_17 = arith.constant 0 : index
      %c0_18 = arith.constant 0 : index
      %20 = vector.load %arg5[%c0_17, %c0_18] : memref<1x128xf32, #tpu.memory_space<vmem>>, vector<1x128xf32>
      %21 = vector.broadcast %20 : vector<1x128xf32> to vector<2x128xf32>
      %22 = arith.addf %19, %21 : vector<2x128xf32>
      %c0_19 = arith.constant 0 : index
      %c0_20 = arith.constant 0 : index
      %23 = vector.load %arg6[%c0_19, %c0_20] : memref<2x128xf32, #tpu.memory_space<vmem>>, vector<2x128xf32>
      tpu.vector_store %arg6[%c0_19, %c0_20], %22 {strides = array<i32>} : memref<2x128xf32, #tpu.memory_space<vmem>>, vector<2x128xf32>,
    } else {
    }
    return
  }
  func.func @transform_0(%arg0: i32) -> (i32, i32) {
    %c0_i32 = arith.constant 0 : i32
    %c0_i32_0 = arith.constant 0 : i32
    return %c0_i32, %arg0 : i32, i32
  }
  func.func @transform_1(%arg0: i32) -> (i32, i32) {
    %c0_i32 = arith.constant 0 : i32
    %c0_i32_0 = arith.constant 0 : i32
    return %arg0, %c0_i32 : i32, i32
  }
  func.func @transform_2(%arg0: i32) -> (i32, i32) {
    %c0_i32 = arith.constant 0 : i32
    %c0_i32_0 = arith.constant 0 : i32
    %c0_i32_1 = arith.constant 0 : i32
    return %c0_i32, %c0_i32_0 : i32, i32
  }
  func.func @transform_3(%arg0: i32) -> (i32, i32) {
    %c0_i32 = arith.constant 0 : i32
    %c0_i32_0 = arith.constant 0 : i32
    %c0_i32_1 = arith.constant 0 : i32
    return %c0_i32, %c0_i32_0 : i32, i32
  }
  func.func @transform_4(%arg0: i32) -> (i32, i32) {
    %c0_i32 = arith.constant 0 : i32
    %c0_i32_0 = arith.constant 0 : i32
    %c0_i32_1 = arith.constant 0 : i32
    return %c0_i32, %c0_i32_0 : i32, i32
  }
  func.func @transform_5(%arg0: i32) -> (i32, i32) {
    %c0_i32 = arith.constant 0 : i32
    %c0_i32_0 = arith.constant 0 : i32
    %c0_i32_1 = arith.constant 0 : i32
    return %c0_i32, %c0_i32_0 : i32, i32
  }
}

</mosaic_0001>

<bundles_post_ra>
// kernel: tpu_custom_call.1
= control target key start
LH: loop header
LB: loop body
LE: loop exit
PB: predicated region body
PF: predicated region fallthrough
CT: control target
= control target key end

     0   :  { %10 = vsyncpa [#allocation4], 0  ;;  %s1394_s18 = smov 0   ;;  %s1693_s0 = inlined_call_operand.vmem [shape: bf16[2,1024], index: 0, kind: input, shape index: {}]   ;;  %s1694_s1 = inlined_call_operand.vmem [shape: bf16[1024,400], index: 1, kind: input, shape index: {}]   ;;  %s1695_s2 = inlined_call_operand.vmem [shape: f32[1,400], index: 2, kind: input, shape index: {}]   ;;  %s1696_s3 = inlined_call_operand.vmem [shape: f32[400,128], index: 3, kind: input, shape index: {}]   ;;  %s1697_s4 = inlined_call_operand.vmem [shape: f32[1,128], index: 4, kind: input, shape index: {}]   ;;  %s1698_s5 = inlined_call_operand.hbm [shape: f32[2,128], index: 5, kind: output, shape index: {}]  }
   0x1 LB: > { %s1400_s19 = sadd.s32 4294967295, %s1357_s18   ;;  %p1094_p0 = scmp.ge.s32.totalorder %s1357_s18, 1  ;;  %s1357_s18 = sphi %s1394_s18, %s16_s18  }
   0x2   : > { %p195_p1 = scmp.lt.s32.totalorder %s1357_s18, 5 }
   0x4   : > { %p196_p2 = pnand %p1094_p0, %p195_p1 }
   0x5   : > { %s1095_s20 = sshll.u32 (!%p196_p2), %s1400_s19, 1  ;;  %s1096_s21 = sshll.u32 (!%p196_p2), %s1400_s19, 5 }
   0x6   : > { %199 = sbr.rel (%p196_p2) target bundleno = 543 (0x21f), region = 40  ;;  %p224_p3 = scmp.lt.s32.totalorder (!%p196_p2), %s1095_s20, 7 }
   0x7   : > { %p229_p4 = scmp.lt.s32.totalorder (!%p196_p2), %s1096_s21, 127  ;;  %p1099_p5 = scmp.ne.s32.totalorder (!%p196_p2), %s1400_s19, 0 }
   0xb   : > { %s1700_s20 = smov (!%p224_p3, %s1095_s20), 7  ;;  %s1702_s21 = smov (!%p229_p4, %s1096_s21), 127 }
   0xc   : > { %s226_s24 = scalar_lea.vmem %s1693_s0, %s1700_s20  ;;  %s1172_s25 = sshll.u32 %s1702_s21, 4 }
   0xd   : > { %s1415_s28 = scalar_lea.vmem %s1694_s1, %s1172_s25  ;;  %238 = sbr.rel (%p1099_p5) target bundleno = 23 (0x17), region = 44 }
  0x12   : > { %vm239_vm0 = vcmask 1041408   ;;  %vm240_vm1 = vcmask 1043458   ;;  %vm242_vm2 = vcmask 1045508   ;;  %vm244_vm3 = vcmask 130054  }
  0x13   : > { %vm241_vm4 = vmor %vm240_vm1, %vm239_vm0  ;;  %v1359_v0 = vmov 0.0  }
  0x14   : > { %vm243_vm5 = vmor %vm242_vm2, %vm241_vm4 }
  0x15   : > { %vm245_vm6 = vmor %vm244_vm3, %vm243_vm5 }
  0x16   : > { %246 = vst.msk [vmem:[#allocation2] sm:$0xff] %vm245_vm6, %v1359_v0 }
  0x17 PF: > { %v1227_v1 = vld [vmem:[%s1415_s28 + $0xe4] ss:$16 sps:$4 sm:$0xff]   ;;  %v1229_v2 = vld [vmem:[%s1415_s28 + $0xec] ss:$16 sps:$4 sm:$0xff]   ;;  %v1231_v3 = vld [vmem:[%s1415_s28 + $0xe0] ss:$16 sps:$4 sm:$0xff]   ;;  %v325_v41 = vlaneseq }
  0x18   : > { %658 = vmatprep.subr.bf16.mxu0 %v1227_v1  ;;  %v1232_v4 = vld [vmem:[%s1415_s28 + $0xe8] ss:$16 sps:$4 sm:$0xff]   ;;  %699 = vmatprep.subr.bf16.mxu1 %v1229_v2  ;;  %v1233_v5 = vld [vmem:[%s1415_s28 + $0xc4] ss:$16 sps:$4 sm:$0xff]   ;;  %v1235_v6 = vld [vmem:[%s1415_s28 + $0xcc] ss:$16 sps:$4 sm:$0xff]  }
  0x19   : > { %659 = vmatpush1.bf16.msra.mxu0 %v1231_v3  ;;  %700 = vmatpush1.bf16.msra.mxu1 %v1232_v4  ;;  %v1237_v7 = vld [vmem:[%s1415_s28 + $0xc0] ss:$16 sps:$4 sm:$0xff]   ;;  %v1238_v8 = vld [vmem:[%s1415_s28 + $0xc8] ss:$16 sps:$4 sm:$0xff]   ;;  %v1239_v9 = vld [vmem:[%s1415_s28 + $0xa4] ss:$16 sps:$4 sm:$0xff]  }
  0x1a   : > { %660 = vmatprep.subr.bf16.mxu0 %v1233_v5  ;;  %701 = vmatprep.subr.bf16.mxu1 %v1235_v6  ;;  %v1241_v10 = vld [vmem:[%s1415_s28 + $0xac] ss:$16 sps:$4 sm:$0xff]   ;;  %v1243_v11 = vld [vmem:[%s1415_s28 + $0xa0] ss:$16 sps:$4 sm:$0xff]   ;;  %v1244_v12 = vld [vmem:[%s1415_s28 + $0xa8] ss:$16 sps:$4 sm:$0xff]  }
  0x1b   : > { %v1245_v13 = vld [vmem:[%s1415_s28 + $0x84] ss:$16 sps:$4 sm:$0xff]   ;;  %v1247_v14 = vld [vmem:[%s1415_s28 + $0x8c] ss:$16 sps:$4 sm:$0xff]   ;;  %v1249_v15 = vld [vmem:[%s1415_s28 + $0x80] ss:$16 sps:$4 sm:$0xff]  }
  0x1c   : > { %v1250_v16 = vld [vmem:[%s1415_s28 + $0x88] ss:$16 sps:$4 sm:$0xff]   ;;  %v1251_v17 = vld [vmem:[%s1415_s28 + $0x64] ss:$16 sps:$4 sm:$0xff]   ;;  %v1253_v18 = vld [vmem:[%s1415_s28 + $0x6c] ss:$16 sps:$4 sm:$0xff]  }
  0x1d   : > { %661 = vmatpush1.bf16.msra.mxu0 %v1237_v7  ;;  %702 = vmatpush1.bf16.msra.mxu1 %v1238_v8  ;;  %v1255_v19 = vld [vmem:[%s1415_s28 + $0x60] ss:$16 sps:$4 sm:$0xff]   ;;  %v1256_v20 = vld [vmem:[%s1415_s28 + $0x68] ss:$16 sps:$4 sm:$0xff]   ;;  %v1257_v21 = vld [vmem:[%s1415_s28 + $0x44] ss:$16 sps:$4 sm:$0xff]  }
  0x1e   : > { %662 = vmatprep.subr.bf16.mxu0 %v1239_v9  ;;  %703 = vmatprep.subr.bf16.mxu1 %v1241_v10  ;;  %v1259_v22 = vld [vmem:[%s1415_s28 + $0x4c] ss:$16 sps:$4 sm:$0xff]   ;;  %v1261_v23 = vld [vmem:[%s1415_s28 + $0x40] ss:$16 sps:$4 sm:$0xff]   ;;  %v1262_v24 = vld [vmem:[%s1415_s28 + $0x48] ss:$16 sps:$4 sm:$0xff]  }
  0x1f   : > { %v1263_v25 = vld [vmem:[%s1415_s28 + $0x24] ss:$16 sps:$4 sm:$0xff]   ;;  %v1265_v26 = vld [vmem:[%s1415_s28 + $0x2c] ss:$16 sps:$4 sm:$0xff]   ;;  %v1267_v27 = vld [vmem:[%s1415_s28 + $0x20] ss:$16 sps:$4 sm:$0xff]  }
  0x20   : > { %v1268_v28 = vld [vmem:[%s1415_s28 + $0x28] ss:$16 sps:$4 sm:$0xff]   ;;  %v1269_v29 = vld [vmem:[%s1415_s28 + $0x4] ss:$16 sps:$4 sm:$0xff]   ;;  %v1271_v30 = vld [vmem:[%s1415_s28 + $0xc] ss:$16 sps:$4 sm:$0xff]  }
  0x21   : > { %663 = vmatpush1.bf16.msra.mxu0 %v1243_v11  ;;  %704 = vmatpush1.bf16.msra.mxu1 %v1244_v12  ;;  %v1273_v31 = vld [vmem:[%s1415_s28] ss:$16 sps:$4 sm:$0xff]   ;;  %v1274_v32 = vld [vmem:[%s1415_s28 + $0x8] ss:$16 sps:$4 sm:$0xff]   ;;  %v1275_v33 = vld [vmem:[%s1415_s28 + $0x1e4] ss:$16 sps:$4 sm:$0xff]  }
  0x22   : > { %664 = vmatprep.subr.bf16.mxu0 %v1245_v13  ;;  %705 = vmatprep.subr.bf16.mxu1 %v1247_v14  ;;  %v1277_v34 = vld [vmem:[%s1415_s28 + $0x1ec] ss:$16 sps:$4 sm:$0xff]   ;;  %v1279_v35 = vld [vmem:[%s1415_s28 + $0x1e0] ss:$16 sps:$4 sm:$0xff]   ;;  %v1280_v36 = vld [vmem:[%s1415_s28 + $0x1e8] ss:$16 sps:$4 sm:$0xff]  }
  0x23   : > { %v1281_v37 = vld [vmem:[%s1415_s28 + $0x1c4] ss:$16 sps:$4 sm:$0xff]   ;;  %v1283_v38 = vld [vmem:[%s1415_s28 + $0x1cc] ss:$16 sps:$4 sm:$0xff]   ;;  %v1360_v39 = vmov 1966171168  }
  0x24   : > { %v323_v40 = vunpack.c.l.s4 %v1360_v39  ;;  %v1285_v42 = vld [vmem:[%s1415_s28 + $0x1c0] ss:$16 sps:$4 sm:$0xff]   ;;  %v1286_v43 = vld [vmem:[%s1415_s28 + $0x1c8] ss:$16 sps:$4 sm:$0xff]   ;;  %v1287_v44 = vld [vmem:[%s1415_s28 + $0x1a4] ss:$16 sps:$4 sm:$0xff]  }
  0x25   : > { %665 = vmatpush1.bf16.msra.mxu0 %v1249_v15  ;;  %706 = vmatpush1.bf16.msra.mxu1 %v1250_v16  ;;  %v1289_v45 = vld [vmem:[%s1415_s28 + $0x1ac] ss:$16 sps:$4 sm:$0xff]   ;;  %v1460_v47 = vshrl.u32 %v325_v41, 7  ;;  %v1291_v48 = vld [vmem:[%s1415_s28 + $0x1a0] ss:$16 sps:$4 sm:$0xff]   ;;  %vm763_vm7 = vcmask 1041408  }
  0x26   : > { %666 = vmatprep.subr.bf16.mxu0 %v1251_v17  ;;  %707 = vmatprep.subr.bf16.mxu1 %v1253_v18  ;;  %v324_v46 = vunpack.c.0.s8 %v323_v40  ;;  %v1292_v49 = vld [vmem:[%s1415_s28 + $0x1a8] ss:$16 sps:$4 sm:$0xff]   ;;  %v1293_v50 = vld [vmem:[%s1415_s28 + $0x184] ss:$16 sps:$4 sm:$0xff]   ;;  %v1295_v51 = vld [vmem:[%s1415_s28 + $0x18c] ss:$16 sps:$4 sm:$0xff]  }
  0x27   : > { %v1100_v53 = vld.sshfl [vmem:[%s226_s24] sm:$0x11 pattern:$0x75316420]  ;;  %v1298_v55 = vld [vmem:[%s1415_s28 + $0x188] ss:$16 sps:$4 sm:$0xff]  }
  0x28   : > { %v327_v52 = vsub.s32 %v324_v46, %v1460_v47  ;;  %v1297_v54 = vld [vmem:[%s1415_s28 + $0x180] ss:$16 sps:$4 sm:$0xff]   ;;  %v321_v56 = vcombine.high %v1100_v53, %v1100_v53  ;;  %v1299_v57 = vld [vmem:[%s1415_s28 + $0x164] ss:$16 sps:$4 sm:$0xff]   ;;  %v1301_v58 = vld [vmem:[%s1415_s28 + $0x16c] ss:$16 sps:$4 sm:$0xff]  }
  0x29   : > { %667 = vmatpush1.bf16.msra.mxu0 %v1255_v19  ;;  %708 = vmatpush1.bf16.msra.mxu1 %v1256_v20  ;;  %v1303_v60 = vld [vmem:[%s1415_s28 + $0x160] ss:$16 sps:$4 sm:$0xff]   ;;  %v1304_v61 = vld [vmem:[%s1415_s28 + $0x168] ss:$16 sps:$4 sm:$0xff]   ;;  %v1305_v62 = vld [vmem:[%s1415_s28 + $0x144] ss:$16 sps:$4 sm:$0xff]  }
  0x2a   : > { %668 = vmatprep.subr.bf16.mxu0 %v1257_v21  ;;  %709 = vmatprep.subr.bf16.mxu1 %v1259_v22  ;;  %v335_v59 = vrot.slane %v321_v56, %v327_v52  ;;  %v1307_v63 = vld [vmem:[%s1415_s28 + $0x14c] ss:$16 sps:$4 sm:$0xff]   ;;  %v1309_v0 = vld [vmem:[%s1415_s28 + $0x140] ss:$16 sps:$4 sm:$0xff]   ;;  %v1310_v1 = vld [vmem:[%s1415_s28 + $0x148] ss:$16 sps:$4 sm:$0xff]   ;;  %v328_v10 = vrot.slane %v1100_v53, %v327_v52 }
  0x2b   : > { %v1311_v2 = vld [vmem:[%s1415_s28 + $0x124] ss:$16 sps:$4 sm:$0xff]   ;;  %v1313_v3 = vld [vmem:[%s1415_s28 + $0x12c] ss:$16 sps:$4 sm:$0xff]   ;;  %v1315_v4 = vld [vmem:[%s1415_s28 + $0x120] ss:$16 sps:$4 sm:$0xff]  }
  0x2c   : > { %690 = vmatprep.mubr.bf16.mxu0 %v335_v59  ;;  %731 = vmatprep.mubr.bf16.mxu1 %v335_v59  ;;  %v1316_v5 = vld [vmem:[%s1415_s28 + $0x128] ss:$16 sps:$4 sm:$0xff]   ;;  %v1317_v6 = vld [vmem:[%s1415_s28 + $0x104] ss:$16 sps:$4 sm:$0xff]   ;;  %v1319_v7 = vld [vmem:[%s1415_s28 + $0x10c] ss:$16 sps:$4 sm:$0xff]  }
  0x2d   : > { %669 = vmatpush1.bf16.msra.mxu0 %v1261_v23  ;;  %710 = vmatpush1.bf16.msra.mxu1 %v1262_v24  ;;  %v1321_v8 = vld [vmem:[%s1415_s28 + $0x100] ss:$16 sps:$4 sm:$0xff]   ;;  %v1322_v9 = vld [vmem:[%s1415_s28 + $0x108] ss:$16 sps:$4 sm:$0xff]   ;;  %v1361_v11 = vmov 1983009808  }
  0x2e   : > { %670 = vmatprep.subr.bf16.mxu0 %v1263_v25  ;;  %711 = vmatprep.subr.bf16.mxu1 %v1265_v26  ;;  %v747_v12 = vunpack.c.l.s4 %v1361_v11  ;;  %vm764_vm8 = vcmask 1043458   ;;  %vm766_vm10 = vcmask 1045508   ;;  %vm768_vm12 = vcmask 130054   ;;  %v247_v25 = vld [vmem:[#allocation2] sm:$0xff]  ;;  %p1165_p6 = scmp.ne.s32.totalorder %s1400_s19, 3 }
  0x2f   : > { %vm765_vm9 = vmor %vm764_vm8, %vm763_vm7 }
  0x30   : > { %v748_v13 = vunpack.c.0.s8 %v747_v12  ;;  %vm767_vm11 = vmor %vm766_vm10, %vm765_vm9 }
  0x31   : > { %671 = vmatpush1.bf16.msra.mxu0 %v1267_v27  ;;  %712 = vmatpush1.bf16.msra.mxu1 %v1268_v28  ;;  %vm769_vm13 = vmor %vm768_vm12, %vm767_vm11 }
  0x32   : > { %672 = vmatprep.subr.bf16.mxu0 %v1269_v29  ;;  %713 = vmatprep.subr.bf16.mxu1 %v1271_v30  ;;  %v1491_v16 = vsub.s32 %v748_v13, %v1460_v47 }
  0x35   : > { %673 = vmatpush1.bf16.msra.mxu0 %v1273_v31  ;;  %714 = vmatpush1.bf16.msra.mxu1 %v1274_v32 }
  0x36   : > { %674 = vmatprep.subr.bf16.mxu0 %v1275_v33  ;;  %715 = vmatprep.subr.bf16.mxu1 %v1277_v34 }
  0x39   : > { %675 = vmatpush2.bf16.msra.mxu0 %v1279_v35  ;;  %716 = vmatpush2.bf16.msra.mxu1 %v1280_v36 }
  0x3a   : > { %676 = vmatprep.subr.bf16.mxu0 %v1281_v37  ;;  %717 = vmatprep.subr.bf16.mxu1 %v1283_v38 }
  0x3d   : > { %677 = vmatpush2.bf16.msra.mxu0 %v1285_v42  ;;  %718 = vmatpush2.bf16.msra.mxu1 %v1286_v43 }
  0x3e   : > { %678 = vmatprep.subr.bf16.mxu0 %v1287_v44  ;;  %719 = vmatprep.subr.bf16.mxu1 %v1289_v45 }
  0x41   : > { %679 = vmatpush2.bf16.msra.mxu0 %v1291_v48  ;;  %720 = vmatpush2.bf16.msra.mxu1 %v1292_v49 }
  0x42   : > { %680 = vmatprep.subr.bf16.mxu0 %v1293_v50  ;;  %721 = vmatprep.subr.bf16.mxu1 %v1295_v51 }
  0x45   : > { %681 = vmatpush2.bf16.msra.mxu0 %v1297_v54  ;;  %722 = vmatpush2.bf16.msra.mxu1 %v1298_v55 }
  0x46   : > { %682 = vmatprep.subr.bf16.mxu0 %v1299_v57  ;;  %723 = vmatprep.subr.bf16.mxu1 %v1301_v58 }
  0x49   : > { %683 = vmatpush2.bf16.msra.mxu0 %v1303_v60  ;;  %724 = vmatpush2.bf16.msra.mxu1 %v1304_v61 }
  0x4a   : > { %684 = vmatprep.subr.bf16.mxu0 %v1305_v62  ;;  %725 = vmatprep.subr.bf16.mxu1 %v1307_v63 }
  0x4d   : > { %685 = vmatpush2.bf16.msra.mxu0 %v1309_v0  ;;  %726 = vmatpush2.bf16.msra.mxu1 %v1310_v1 }
  0x4e   : > { %686 = vmatprep.subr.bf16.mxu0 %v1311_v2  ;;  %727 = vmatprep.subr.bf16.mxu1 %v1313_v3 }
  0x51   : > { %687 = vmatpush2.bf16.msra.mxu0 %v1315_v4  ;;  %728 = vmatpush2.bf16.msra.mxu1 %v1316_v5 }
  0x52   : > { %688 = vmatprep.subr.bf16.mxu0 %v1317_v6  ;;  %729 = vmatprep.subr.bf16.mxu1 %v1319_v7 }
  0x55   : > { %689 = vmatpush2.bf16.msra.mxu0 %v1321_v8  ;;  %730 = vmatpush2.bf16.msra.mxu1 %v1322_v9 }
  0x58   : > { %691 = vmatmul.mubr.bf16.vlgmr.msra.gmra.mxu0 %v328_v10  ;;  %732 = vmatmul.mubr.bf16.vlgmr.msra.gmra.mxu1 %v328_v10 }
 0x118   : > { %v692_v14 = vpop.f32.mrf.mxu0  ;;  %v733_v15 = vpop.f32.mrf.mxu1 }
 0x11a   : > { %v694_v17 = vpop.f32.mrf.mxu0  ;;  %v735_v18 = vpop.f32.mrf.mxu1 }
 0x11b   : > { %v744_v19 = vcombine.low %v692_v14, %v694_v17  ;;  %v745_v20 = vcombine.low %v733_v15, %v735_v18 }
 0x11c   : > { %v696_v21 = vpop.f32.mrf.mxu0  ;;  %v737_v22 = vpop.f32.mrf.mxu1 }
 0x11d   : > { %v752_v23 = vrot.slane %v744_v19, %v1491_v16  ;;  %v759_v24 = vrot.slane %v745_v20, %v1491_v16 }
 0x11e   : > { %v697_v26 = vpop.f32.mrf.mxu0  ;;  %v738_v27 = vpop.f32.mrf.mxu1 }
 0x11f   : > { %v760_v28 = vcombine.low %v752_v23, %v759_v24  ;;  %774 = sbr.rel (%p1165_p6) target bundleno = 528 (0x210), region = 48 }
 0x121   : > { %v762_v29 = vadd.f32 %v760_v28, %v247_v25 }
 0x123   : > { %770 = vst.msk [vmem:[#allocation2] sm:$0xff] %vm769_vm13, %v762_v29 }
 0x124   : > { %v845_v30 = vld [vmem:[%s1696_s3 + $0xf8] sm:$0xff]  ;;  %v1362_v33 = vmov 0.0   ;;  %v844_v34 = vld [vmem:[%s1696_s3 + $0xf0] sm:$0xff]  ;;  %v843_v37 = vld [vmem:[%s1696_s3 + $0xe8] sm:$0xff]  ;;  %v780_v56 = vsub.s32 0, %v1460_v47  ;;  %v784_v57 = vsub.s32 1, %v1460_v47 }
 0x125   : > { %v829_v31 = vld [vmem:[%s1696_s3 + $0x78] sm:$0xff]  ;;  %1173 = vmatprep.subr.mxu0 %v845_v30  ;;  %965 = vmatprep.subr.mxu1 %v1362_v33  ;;  %v828_v35 = vld [vmem:[%s1696_s3 + $0x70] sm:$0xff]  ;;  %v827_v38 = vld [vmem:[%s1696_s3 + $0x68] sm:$0xff]  ;;  %v788_v58 = vsub.s32 2, %v1460_v47  ;;  %v792_v60 = vsub.s32 3, %v1460_v47  ;;  %vm892_vm14 = vcmask 130048  }
 0x126   : > { %v861_v32 = vld [vmem:[%s1696_s3 + $0x178] sm:$0xff]  ;;  %v860_v36 = vld [vmem:[%s1696_s3 + $0x170] sm:$0xff]  ;;  %1174 = vmatpush3.msra.mxu0 %v829_v31  ;;  %v859_v39 = vld [vmem:[%s1696_s3 + $0x168] sm:$0xff] }
 0x127   : > { %966 = vmatpush1.msra.mxu1 %v861_v32  ;;  %1175 = vmatprep.subr.mxu0 %v844_v34  ;;  %v842_v40 = vld [vmem:[%s1696_s3 + $0xe0] sm:$0xff]  ;;  %v841_v43 = vld [vmem:[%s1696_s3 + $0xd8] sm:$0xff]  ;;  %v840_v46 = vld [vmem:[%s1696_s3 + $0xd0] sm:$0xff] }
 0x128   : > { %967 = vmatprep.subr.mxu1 %v1362_v33  ;;  %1176 = vmatpush3.msra.mxu0 %v828_v35  ;;  %v826_v41 = vld [vmem:[%s1696_s3 + $0x60] sm:$0xff]  ;;  %v825_v44 = vld [vmem:[%s1696_s3 + $0x58] sm:$0xff]  ;;  %v824_v48 = vld [vmem:[%s1696_s3 + $0x50] sm:$0xff] }
 0x129   : > { %968 = vmatpush1.msra.mxu1 %v860_v36  ;;  %1177 = vmatprep.subr.mxu0 %v843_v37  ;;  %v858_v42 = vld [vmem:[%s1696_s3 + $0x160] sm:$0xff]  ;;  %v857_v45 = vld [vmem:[%s1696_s3 + $0x158] sm:$0xff]  ;;  %v856_v49 = vld [vmem:[%s1696_s3 + $0x150] sm:$0xff] }
 0x12a   : > { %969 = vmatprep.subr.mxu1 %v1362_v33  ;;  %1178 = vmatpush3.msra.mxu0 %v827_v38  ;;  %v839_v50 = vld [vmem:[%s1696_s3 + $0xc8] sm:$0xff]  ;;  %v838_v53 = vld [vmem:[%s1696_s3 + $0xc0] sm:$0xff]  ;;  %v837_v59 = vld [vmem:[%s1696_s3 + $0xb8] sm:$0xff] }
 0x12b   : > { %970 = vmatpush1.msra.mxu1 %v859_v39  ;;  %1179 = vmatprep.subr.mxu0 %v842_v40  ;;  %v823_v51 = vld [vmem:[%s1696_s3 + $0x48] sm:$0xff]  ;;  %v822_v54 = vld [vmem:[%s1696_s3 + $0x40] sm:$0xff]  ;;  %v821_v61 = vld [vmem:[%s1696_s3 + $0x38] sm:$0xff] }
 0x12c   : > { %971 = vmatprep.subr.mxu1 %v1362_v33  ;;  %1180 = vmatpush3.msra.mxu0 %v826_v41  ;;  %v855_v52 = vld [vmem:[%s1696_s3 + $0x148] sm:$0xff]  ;;  %v854_v55 = vld [vmem:[%s1696_s3 + $0x140] sm:$0xff]  ;;  %v853_v62 = vld [vmem:[%s1696_s3 + $0x138] sm:$0xff] }
 0x12d   : > { %972 = vmatpush1.msra.mxu1 %v858_v42  ;;  %1181 = vmatprep.subr.mxu0 %v841_v43  ;;  %v836_v63 = vld [vmem:[%s1696_s3 + $0xb0] sm:$0xff]  ;;  %v776_v47 = vld [vmem:[%s1695_s2] sm:$0xf]  ;;  %v835_v5 = vld [vmem:[%s1696_s3 + $0xa8] sm:$0xff] }
 0x12e   : > { %973 = vmatprep.subr.mxu1 %v1362_v33  ;;  %1182 = vmatpush3.msra.mxu0 %v825_v44  ;;  %v820_v0 = vld [vmem:[%s1696_s3 + $0x30] sm:$0xff]  ;;  %v781_v2 = vrot.slane %v776_v47, %v780_v56  ;;  %v785_v3 = vrot.slane %v776_v47, %v784_v57  ;;  %v789_v4 = vrot.slane %v776_v47, %v788_v58  ;;  %v819_v7 = vld [vmem:[%s1696_s3 + $0x28] sm:$0xff]  ;;  %v834_v10 = vld [vmem:[%s1696_s3 + $0xa0] sm:$0xff] }
 0x12f   : > { %974 = vmatpush1.msra.mxu1 %v857_v45  ;;  %1183 = vmatprep.subr.mxu0 %v840_v46  ;;  %v852_v1 = vld [vmem:[%s1696_s3 + $0x130] sm:$0xff]  ;;  %v793_v6 = vrot.slane %v776_v47, %v792_v60  ;;  %v851_v8 = vld [vmem:[%s1696_s3 + $0x128] sm:$0xff]  ;;  %v818_v12 = vld [vmem:[%s1696_s3 + $0x20] sm:$0xff] }
 0x130   : > { %975 = vmatprep.subr.mxu1 %v1362_v33  ;;  %1184 = vmatpush3.msra.mxu0 %v824_v48  ;;  %v794_v9 = vcombine.low %v781_v2, %v785_v3  ;;  %v850_v13 = vld [vmem:[%s1696_s3 + $0x120] sm:$0xff]  ;;  %v833_v15 = vld [vmem:[%s1696_s3 + $0x98] sm:$0xff]  ;;  %v832_v21 = vld [vmem:[%s1696_s3 + $0x90] sm:$0xff] }
 0x131   : > { %976 = vmatpush1.msra.mxu1 %v856_v49  ;;  %1185 = vmatprep.subr.mxu0 %v839_v50  ;;  %v795_v11 = vcombine.low %v789_v4, %v793_v6  ;;  %v817_v18 = vld [vmem:[%s1696_s3 + $0x18] sm:$0xff]  ;;  %v775_v20 = vld [vmem:[#allocation2] sm:$0xff]  ;;  %v816_v23 = vld [vmem:[%s1696_s3 + $0x10] sm:$0xff] }
 0x132   : > { %977 = vmatprep.subr.mxu1 %v1362_v33  ;;  %1186 = vmatpush3.msra.mxu0 %v823_v51  ;;  %v802_v14 = vrot.slane %v794_v9, %v1491_v16  ;;  %v849_v19 = vld [vmem:[%s1696_s3 + $0x118] sm:$0xff]  ;;  %v848_v24 = vld [vmem:[%s1696_s3 + $0x110] sm:$0xff]  ;;  %v831_v25 = vld [vmem:[%s1696_s3 + $0x88] sm:$0xff] }
 0x133   : > { %978 = vmatpush1.msra.mxu1 %v855_v52  ;;  %1187 = vmatprep.subr.mxu0 %v838_v53  ;;  %v809_v17 = vrot.slane %v795_v11, %v1491_v16  ;;  %v815_v27 = vld [vmem:[%s1696_s3 + $0x8] sm:$0xff]  ;;  %v830_v29 = vld [vmem:[%s1696_s3 + $0x80] sm:$0xff] }
 0x134   : > { %979 = vmatprep.subr.mxu1 %v1362_v33  ;;  %1188 = vmatpush3.msra.mxu0 %v822_v54  ;;  %v847_v28 = vld [vmem:[%s1696_s3 + $0x108] sm:$0xff]  ;;  %v814_v31 = vld [vmem:[%s1696_s3] sm:$0xff] }
 0x135   : > { %980 = vmatpush1.msra.mxu1 %v854_v55  ;;  %1189 = vmatprep.subr.mxu0 %v837_v59  ;;  %v810_v22 = vcombine.low %v802_v14, %v809_v17  ;;  %v846_v32 = vld [vmem:[%s1696_s3 + $0x100] sm:$0xff]  ;;  %v863_v36 = vld [vmem:[%s1696_s3 + $0x188] sm:$0xff] }
 0x136   : > { %981 = vmatprep.subr.mxu1 %v1362_v33  ;;  %1190 = vmatpush3.msra.mxu0 %v821_v61  ;;  %v862_v39 = vld [vmem:[%s1696_s3 + $0x180] sm:$0xff] }
 0x137   : > { %982 = vmatpush1.msra.mxu1 %v853_v62  ;;  %1191 = vmatprep.subr.mxu0 %v836_v63  ;;  %v812_v26 = vadd.f32 %v810_v22, %v775_v20 }
 0x138   : > { %983 = vmatprep.subr.mxu1 %v1362_v33  ;;  %1192 = vmatpush3.msra.mxu0 %v820_v0 }
 0x139   : > { %984 = vmatpush1.msra.mxu1 %v852_v1  ;;  %1193 = vmatprep.subr.mxu0 %v835_v5  ;;  %v813_v30 = vmax.f32 %v812_v26, 0.0 }
 0x13a   : > { %985 = vmatprep.subr.mxu1 %v1362_v33  ;;  %1194 = vmatpush3.msra.mxu0 %v819_v7 }
 0x13b   : > { %986 = vmatpush1.msra.mxu1 %v851_v8  ;;  %1195 = vmatprep.subr.mxu0 %v834_v10  ;;  %v879_v34 = vrot.slane %v813_v30, %v1491_v16  ;;  %v872_v35 = vcombine.high %v813_v30, %v813_v30 }
 0x13c   : > { %987 = vmatprep.subr.mxu1 %v1362_v33  ;;  %1196 = vmatpush3.msra.mxu0 %v818_v12 }
 0x13d   : > { %988 = vmatpush1.msra.mxu1 %v850_v13  ;;  %1197 = vmatprep.subr.mxu0 %v833_v15  ;;  %v887_v37 = vcombine.high %v879_v34, %v879_v34  ;;  %v886_v38 = vrot.slane %v872_v35, %v1491_v16  ;;  %v1166_v16 = vld [vmem:[%s1697_s4] ss:$0 sm:$0xff] }
 0x13e   : > { %989 = vmatprep.subr.mxu1 %v1362_v33  ;;  %1198 = vmatpush3.msra.mxu0 %v817_v18 }
 0x13f   : > { %990 = vmatpush1.msra.mxu1 %v849_v19  ;;  %1199 = vmatprep.subr.mxu0 %v832_v21  ;;  %v888_v40 = vcombine.high %v886_v38, %v886_v38 }
 0x140   : > { %991 = vmatprep.subr.mxu1 %v1362_v33  ;;  %1200 = vmatpush3.msra.mxu0 %v816_v23 }
 0x141   : > { %992 = vmatpush1.msra.mxu1 %v848_v24  ;;  %1201 = vmatprep.subr.mxu0 %v831_v25 }
 0x142   : > { %993 = vmatprep.subr.mxu1 %v1362_v33  ;;  %1202 = vmatpush3.msra.mxu0 %v815_v27 }
 0x143   : > { %994 = vmatpush1.msra.mxu1 %v847_v28  ;;  %1203 = vmatprep.subr.mxu0 %v830_v29 }
 0x144   : > { %995 = vmatprep.subr.mxu1 %v1362_v33  ;;  %1204 = vmatpush3.msra.mxu0 %v814_v31 }
 0x145   : > { %996 = vmatpush1.msra.mxu1 %v846_v32  ;;  %959 = vmatprep.mubr.f32.mxu0 %v887_v37 }
 0x146   : > { %1025 = vmatprep.subr.mxu1 %v1362_v33  ;;  %960 = vmatmul.mubr.f32.vlgmr.msra.gmra.mxu0 %v879_v34 }
 0x147   : > { %1026 = vmatpush2.msra.mxu1 %v863_v36  ;;  %1167 = vmatprep.mubr.msk.f32.mxu1 %vm892_vm14, %v888_v40 }
 0x148   : > { %1027 = vmatprep.subr.mxu1 %v1362_v33 }
 0x149   : > { %1028 = vmatpush2.msra.mxu1 %v862_v39 }
 0x14a   : > { %1030 = vmatmul.mubr.f32.vlgmr.msra.gmra.mxu1 %v886_v38 }
 0x206   : > { %v1205_v41 = vpop.f32.mrf.mxu0 }
 0x208   : > { %v1206_v42 = vpop.f32.mrf.mxu0 }
 0x209   : > { %v1207_v44 = vadd.f32 %v1206_v42, %v1205_v41 }
 0x20a   : > { %v1031_v43 = vpop.f32.mrf.mxu1 }
 0x20b   : > { %v962_v46 = vadd.f32 %v1207_v44, %v1166_v16 }
 0x20c   : > { %v1033_v45 = vpop.f32.mrf.mxu1 }
 0x20d   : > { %v1032_v48 = vadd.f32 %v1031_v43, %v962_v46 }
 0x20f   : > { %1035 = vst [vmem:[#allocation3] sm:$0x3] %v1032_v48 }
 0x210 PF: > { %p1212_p7 = scmp.eq.s32.totalorder %s1400_s19, 3  ;;  %s1363_s20 = smov [#allocation3]  }
 0x211   : > { %s1043_s21 = sshll.u32 %s1363_s20, 4  ;;  %s1044_s21 = int_to_ptr.vmem [resolvable:$true] %s1043_s21 }
 0x212   : > { %s1323_s22 = scalar_lea.vmem %s1044_s21, 32  ;;  %p1330_p11 = scmp.lt.s32.totalorder %s1044_s21, %s1044_s21 }
 0x213   : > { %p1324_p8 = scmp.ne.s32.totalorder %s1044_s21, %s1323_s22  ;;  %p1331_p12 = scmp.lt.s32.totalorder %s1323_s22, %s1323_s22 }
 0x215   : > { %p1325_p9 = pnand %p1324_p8, %p1212_p7  ;;  %p1332_p13 = por %p1331_p12, %p1330_p11 }
 0x217   : > { %p1326_p10 = pneg %p1325_p9 }
 0x219   : > { %p1333_p0 = pnand %p1332_p13, %p1326_p10 }
 0x21b   : > { %1336 = shalt.err (!%p1333_p0)
}
 0x21c   : > { %1209 = dma.vmem_to_hbm [thread:$0]  (%p1212_p7), %s1044_s21, 32, %s1698_s5, [#allocation4]  }
 0x21d   : > { %1352 = dma.done.wait (%p1212_p7), [#allocation4], 32  }
 0x21e   : > { %1354 = vsyncadd (%p1212_p7), [#allocation4], 4294967264 }
 0x21f PF: > { %s16_s18 = sadd.s32 1, %s1357_s18  }
 0x220   : > { %p13_p1 = scmp.ge.s32.totalorder %s16_s18, 6  }
 0x222   :  { %15 = sbr.rel (!%p13_p1) target bundleno = 1 (0x1), region = 78 }
 0x227   :  { %1056 = vsyncpa [#allocation4], 1 }
 0x228   :  { %1058 = vsyncpa [#allocation4 + $0x1], 1 }

</bundles_post_ra>
